<compile_context>
chip_gen: v7x
topology: tpu7x:2x2x1
jax: 0.10.0
libtpu: 0.0.40
codegen_flags: <defaults>
</compile_context>

<pallas_src>
import jax
import jax.numpy as jnp
from jax.experimental import pallas as pl
from jax.experimental.pallas import tpu as pltpu

LANE = 128


def _round_up(n, m):
    return ((n + m - 1) // m) * m


def policy_mlp_kernel(x_ref, w1_ref, b1_ref, w2_ref, b2_ref, w3_ref, b3_ref,
                      out_ref):
    """One batch tile: fused 3-layer MLP + numerically-stable softmax."""
    x = x_ref[...]                                        # [TB, D_in]

    # Layer 1: Linear(D_in, 128pad) + ReLU  (MXU, f32 accumulate)
    h1 = jnp.dot(x, w1_ref[...], preferred_element_type=jnp.float32)
    h1 = jnp.maximum(h1 + b1_ref[...], 0.0)               # [TB, 128]

    # Layer 2: Linear(128pad, 128pad) + ReLU
    h2 = jnp.dot(h1, w2_ref[...], preferred_element_type=jnp.float32)
    h2 = jnp.maximum(h2 + b2_ref[...], 0.0)               # [TB, 128]

    # Layer 3: Linear(128pad, D_out_pad). Padded lanes carry a -1e30 bias so
    # they vanish under the softmax below.
    logits = jnp.dot(h2, w3_ref[...], preferred_element_type=jnp.float32)
    logits = logits + b3_ref[...]                         # [TB, D_out_pad]

    # Softmax over the (padded) last dim; divide moved to EUP via reciprocal.
    m = jnp.max(logits, axis=-1, keepdims=True)
    e = jnp.exp(logits - m)
    s = jnp.sum(e, axis=-1, keepdims=True)
    out_ref[...] = (e * pl.reciprocal(s, approx=False)).astype(out_ref.dtype)


def policy_network_forward(x, params, *, batch_tile=512):
    """x: [B, input_dim] float32.  params: dict of [in,out] weights / [1,out] biases."""
    w1, b1, w2, b2, w3, b3 = (params["w1"], params["b1"], params["w2"],
                              params["b2"], params["w3"], params["b3"])
    B, D_in = x.shape
    H1, H2 = w1.shape[1], w2.shape[1]
    D_out = w3.shape[1]

    H1p = _round_up(H1, LANE)
    H2p = _round_up(H2, LANE)
    D_out_p = _round_up(D_out, LANE)

    # Zero-pad hidden widths (exact: relu(0)=0, padded weight rows are 0).
    w1p = jnp.zeros((D_in, H1p), jnp.float32).at[:, :H1].set(w1)
    b1p = jnp.zeros((1, H1p), jnp.float32).at[:, :H1].set(b1)
    w2p = jnp.zeros((H1p, H2p), jnp.float32).at[:H1, :H2].set(w2)
    b2p = jnp.zeros((1, H2p), jnp.float32).at[:, :H2].set(b2)
    # Output padding: zero weights + huge-negative bias -> ~0 softmax mass.
    w3p = jnp.zeros((H2p, D_out_p), jnp.float32).at[:H2, :D_out].set(w3)
    b3p = jnp.full((1, D_out_p), -1e30, jnp.float32).at[:, :D_out].set(b3)

    # Batch tiling: tile must be a multiple of 8 sublanes; pad B to a multiple
    # of the tile so every grid block is dense (no partial-block garbage).
    TB = min(batch_tile, _round_up(B, 8))
    Bp = _round_up(B, TB)
    xp = x if Bp == B else jnp.zeros((Bp, D_in), x.dtype).at[:B].set(x)

    const = lambda a: pl.BlockSpec(a.shape, lambda i: (0,) * a.ndim)

    out = pl.pallas_call(
        policy_mlp_kernel,
        out_shape=jax.ShapeDtypeStruct((Bp, D_out_p), jnp.float32),
        grid=(Bp // TB,),
        in_specs=[
            pl.BlockSpec((TB, D_in), lambda i: (i, 0)),   # x: streamed over B
            const(w1p), const(b1p),                       # weights: resident
            const(w2p), const(b2p),
            const(w3p), const(b3p),
        ],
        out_specs=pl.BlockSpec((TB, D_out_p), lambda i: (i, 0)),
        compiler_params=pltpu.CompilerParams(
            dimension_semantics=("parallel",)),
    )(xp, w1p, b1p, w2p, b2p, w3p, b3p)

    return out[:B, :D_out]


def init_params(key, input_dim, output_dim):
    """Deterministic init mirroring PyTorch Linear's U(-1/sqrt(fan_in), +)."""
    ks = jax.random.split(key, 6)

    def lin(kw, kb, fan_in, fan_out):
        bound = 1.0 / jnp.sqrt(fan_in)
        w = jax.random.uniform(kw, (fan_in, fan_out), jnp.float32, -bound, bound)
        b = jax.random.uniform(kb, (1, fan_out), jnp.float32, -bound, bound)
        return w, b

    w1, b1 = lin(ks[0], ks[1], input_dim, 64)
    w2, b2 = lin(ks[2], ks[3], 64, 32)
    w3, b3 = lin(ks[4], ks[5], 32, output_dim)
    return dict(w1=w1, b1=b1, w2=w2, b2=b2, w3=w3, b3=b3)


def _ref(x, p):
    h1 = jnp.maximum(x @ p["w1"] + p["b1"], 0.0)
    h2 = jnp.maximum(h1 @ p["w2"] + p["b2"], 0.0)
    return jax.nn.softmax(h2 @ p["w3"] + p["b3"], axis=-1)


if __name__ == "__main__":
    key = jax.random.PRNGKey(0)
    k_x, k_x2, k_p = jax.random.split(key, 3)

    batch = 8
    input_dim = 16
    output_dim = 4

    params = init_params(k_p, input_dim, output_dim)

    # Small batch (single grid step).
    x = jax.random.normal(k_x, (batch, input_dim), jnp.float32)
    out = policy_network_forward(x, params)
    jax.block_until_ready(out)
    expected = _ref(x, params)
    assert out.shape == (batch, output_dim)
    assert jnp.allclose(out, expected, atol=1e-5, rtol=1e-5)
    assert jnp.allclose(jnp.sum(out, axis=-1), 1.0, atol=1e-5)

    # Larger, non-multiple batch exercises the batch grid + padding path.
    big_batch = 1056
    x2 = jax.random.normal(k_x2, (big_batch, input_dim), jnp.float32)
    out2 = policy_network_forward(x2, params)
    jax.block_until_ready(out2)
    expected2 = _ref(x2, params)
    assert out2.shape == (big_batch, output_dim)
    assert jnp.allclose(out2, expected2, atol=1e-5, rtol=1e-5)
    assert jnp.allclose(jnp.sum(out2, axis=-1), 1.0, atol=1e-5)

    print("KERNEL_OK")
</pallas_src>

<mosaic_0001>
module attributes {stable_mosaic.version = 11 : i64} {
  func.func @policy_mlp_kernel(%arg0: i32, %arg1: memref<8x16xf32, #tpu.memory_space<vmem>>, %arg2: memref<16x128xf32, #tpu.memory_space<vmem>>, %arg3: memref<1x128xf32, #tpu.memory_space<vmem>>, %arg4: memref<128x128xf32, #tpu.memory_space<vmem>>, %arg5: memref<1x128xf32, #tpu.memory_space<vmem>>, %arg6: memref<128x128xf32, #tpu.memory_space<vmem>>, %arg7: memref<1x128xf32, #tpu.memory_space<vmem>>, %arg8: memref<8x128xf32, #tpu.memory_space<vmem>>) attributes {dimension_semantics = [#tpu.dimension_semantics<parallel>], iteration_bounds = array<i64: 1>, scalar_prefetch = 0 : i64, scratch_operands = 0 : i64, tpu.core_type = #tpu.core_type<tc>, window_params = [{transform_indices = @transform_0, window_bounds = array<i64: 8, 16>}, {pipeline_mode = #tpu.pipeline_mode<synchronous>, transform_indices = @transform_1, window_bounds = array<i64: 16, 128>}, {pipeline_mode = #tpu.pipeline_mode<synchronous>, transform_indices = @transform_2, window_bounds = array<i64: 1, 128>}, {pipeline_mode = #tpu.pipeline_mode<synchronous>, transform_indices = @transform_3, window_bounds = array<i64: 128, 128>}, {pipeline_mode = #tpu.pipeline_mode<synchronous>, transform_indices = @transform_4, window_bounds = array<i64: 1, 128>}, {pipeline_mode = #tpu.pipeline_mode<synchronous>, transform_indices = @transform_5, window_bounds = array<i64: 128, 128>}, {pipeline_mode = #tpu.pipeline_mode<synchronous>, transform_indices = @transform_6, window_bounds = array<i64: 1, 128>}, {transform_indices = @transform_7, window_bounds = array<i64: 8, 128>}]} {
    %c0 = arith.constant 0 : index
    %c0_0 = arith.constant 0 : index
    %0 = vector.load %arg1[%c0, %c0_0] : memref<8x16xf32, #tpu.memory_space<vmem>>, vector<8x16xf32>
    %c0_1 = arith.constant 0 : index
    %c0_2 = arith.constant 0 : index
    %1 = vector.load %arg2[%c0_1, %c0_2] : memref<16x128xf32, #tpu.memory_space<vmem>>, vector<16x128xf32>
    %cst = arith.constant dense<0.000000e+00> : vector<8x128xf32>
    %2 = tpu.matmul %0, %1, %cst {dimension_numbers = #tpu.dot_dimension_numbers<[1], [0], [0], [1], [0, 0, 1, 1], [], []>} : vector<8x16xf32>, vector<16x128xf32>, vector<8x128xf32> -> vector<8x128xf32>
    %c0_3 = arith.constant 0 : index
    %c0_4 = arith.constant 0 : index
    %3 = vector.load %arg3[%c0_3, %c0_4] : memref<1x128xf32, #tpu.memory_space<vmem>>, vector<1x128xf32>
    %4 = vector.broadcast %3 : vector<1x128xf32> to vector<8x128xf32>
    %5 = arith.addf %2, %4 : vector<8x128xf32>
    %cst_5 = arith.constant 0.000000e+00 : f32
    %6 = vector.broadcast %cst_5 : f32 to vector<8x128xf32>
    %7 = arith.maximumf %5, %6 : vector<8x128xf32>
    %c0_6 = arith.constant 0 : index
    %c0_7 = arith.constant 0 : index
    %8 = vector.load %arg4[%c0_6, %c0_7] : memref<128x128xf32, #tpu.memory_space<vmem>>, vector<128x128xf32>
    %cst_8 = arith.constant dense<0.000000e+00> : vector<8x128xf32>
    %9 = tpu.matmul %7, %8, %cst_8 {dimension_numbers = #tpu.dot_dimension_numbers<[1], [0], [0], [1], [0, 0, 1, 1], [], []>} : vector<8x128xf32>, vector<128x128xf32>, vector<8x128xf32> -> vector<8x128xf32>
    %c0_9 = arith.constant 0 : index
    %c0_10 = arith.constant 0 : index
    %10 = vector.load %arg5[%c0_9, %c0_10] : memref<1x128xf32, #tpu.memory_space<vmem>>, vector<1x128xf32>
    %11 = vector.broadcast %10 : vector<1x128xf32> to vector<8x128xf32>
    %12 = arith.addf %9, %11 : vector<8x128xf32>
    %cst_11 = arith.constant 0.000000e+00 : f32
    %13 = vector.broadcast %cst_11 : f32 to vector<8x128xf32>
    %14 = arith.maximumf %12, %13 : vector<8x128xf32>
    %c0_12 = arith.constant 0 : index
    %c0_13 = arith.constant 0 : index
    %15 = vector.load %arg6[%c0_12, %c0_13] : memref<128x128xf32, #tpu.memory_space<vmem>>, vector<128x128xf32>
    %cst_14 = arith.constant dense<0.000000e+00> : vector<8x128xf32>
    %16 = tpu.matmul %14, %15, %cst_14 {dimension_numbers = #tpu.dot_dimension_numbers<[1], [0], [0], [1], [0, 0, 1, 1], [], []>} : vector<8x128xf32>, vector<128x128xf32>, vector<8x128xf32> -> vector<8x128xf32>
    %c0_15 = arith.constant 0 : index
    %c0_16 = arith.constant 0 : index
    %17 = vector.load %arg7[%c0_15, %c0_16] : memref<1x128xf32, #tpu.memory_space<vmem>>, vector<1x128xf32>
    %18 = vector.broadcast %17 : vector<1x128xf32> to vector<8x128xf32>
    %19 = arith.addf %16, %18 : vector<8x128xf32>
    %cst_17 = arith.constant dense<0xFF800000> : vector<8xf32>
    %20 = vector.multi_reduction <maximumf>, %19, %cst_17 [1] : vector<8x128xf32> to vector<8xf32>
    %21 = vector.shape_cast %20 : vector<8xf32> to vector<8x1xf32>
    %22 = vector.broadcast %21 : vector<8x1xf32> to vector<8x128xf32>
    %23 = arith.subf %19, %22 : vector<8x128xf32>
    %24 = math.exp %23 : vector<8x128xf32>
    %cst_18 = arith.constant dense<0.000000e+00> : vector<8xf32>
    %25 = vector.multi_reduction <add>, %24, %cst_18 [1] : vector<8x128xf32> to vector<8xf32>
    %26 = vector.shape_cast %25 : vector<8xf32> to vector<8x1xf32>
    %27 = tpu.reciprocal %26 : vector<8x1xf32> -> vector<8x1xf32>
    %28 = vector.broadcast %27 : vector<8x1xf32> to vector<8x128xf32>
    %29 = arith.mulf %24, %28 : vector<8x128xf32>
    %c0_19 = arith.constant 0 : index
    %c0_20 = arith.constant 0 : index
    %30 = vector.load %arg8[%c0_19, %c0_20] : memref<8x128xf32, #tpu.memory_space<vmem>>, vector<8x128xf32>
    tpu.vector_store %arg8[%c0_19, %c0_20], %29 {strides = array<i32>} : memref<8x128xf32, #tpu.memory_space<vmem>>, vector<8x128xf32>,
    return
  }
  func.func @transform_0(%arg0: i32) -> (i32, i32) {
    %c0_i32 = arith.constant 0 : i32
    %c0_i32_0 = arith.constant 0 : i32
    return %arg0, %c0_i32 : i32, i32
  }
  func.func @transform_1(%arg0: i32) -> (i32, i32) {
    %c0_i32 = arith.constant 0 : i32
    %c0_i32_0 = arith.constant 0 : i32
    %c0_i32_1 = arith.constant 0 : i32
    return %c0_i32, %c0_i32_0 : i32, i32
  }
  func.func @transform_2(%arg0: i32) -> (i32, i32) {
    %c0_i32 = arith.constant 0 : i32
    %c0_i32_0 = arith.constant 0 : i32
    %c0_i32_1 = arith.constant 0 : i32
    return %c0_i32, %c0_i32_0 : i32, i32
  }
  func.func @transform_3(%arg0: i32) -> (i32, i32) {
    %c0_i32 = arith.constant 0 : i32
    %c0_i32_0 = arith.constant 0 : i32
    %c0_i32_1 = arith.constant 0 : i32
    return %c0_i32, %c0_i32_0 : i32, i32
  }
  func.func @transform_4(%arg0: i32) -> (i32, i32) {
    %c0_i32 = arith.constant 0 : i32
    %c0_i32_0 = arith.constant 0 : i32
    %c0_i32_1 = arith.constant 0 : i32
    return %c0_i32, %c0_i32_0 : i32, i32
  }
  func.func @transform_5(%arg0: i32) -> (i32, i32) {
    %c0_i32 = arith.constant 0 : i32
    %c0_i32_0 = arith.constant 0 : i32
    %c0_i32_1 = arith.constant 0 : i32
    return %c0_i32, %c0_i32_0 : i32, i32
  }
  func.func @transform_6(%arg0: i32) -> (i32, i32) {
    %c0_i32 = arith.constant 0 : i32
    %c0_i32_0 = arith.constant 0 : i32
    %c0_i32_1 = arith.constant 0 : i32
    return %c0_i32, %c0_i32_0 : i32, i32
  }
  func.func @transform_7(%arg0: i32) -> (i32, i32) {
    %c0_i32 = arith.constant 0 : i32
    %c0_i32_0 = arith.constant 0 : i32
    return %arg0, %c0_i32 : i32, i32
  }
}

</mosaic_0001>

<bundles_post_ra>
// kernel: tpu_custom_call.1
= control target key start
LH: loop header
LB: loop body
LE: loop exit
PB: predicated region body
PF: predicated region fallthrough
CT: control target
= control target key end

     0   :  { %12 = vsyncpa [#allocation3], 0  ;;  %s828_s0 = inlined_call_operand.hbm [shape: f32[8,16], index: 0, kind: input, shape index: {}]   ;;  %s829_s1 = inlined_call_operand.hbm [shape: f32[16,128], index: 1, kind: input, shape index: {}]   ;;  %s830_s2 = inlined_call_operand.vmem [shape: f32[1,128], index: 2, kind: input, shape index: {}]   ;;  %s831_s3 = inlined_call_operand.hbm [shape: f32[128,128], index: 3, kind: input, shape index: {}]   ;;  %s832_s4 = inlined_call_operand.vmem [shape: f32[1,128], index: 4, kind: input, shape index: {}]   ;;  %s833_s5 = inlined_call_operand.hbm [shape: f32[128,128], index: 5, kind: input, shape index: {}]   ;;  %s834_s6 = inlined_call_operand.vmem [shape: f32[1,128], index: 6, kind: input, shape index: {}]   ;;  %s835_s7 = inlined_call_operand.hbm [shape: f32[8,128], index: 7, kind: output, shape index: {}]  }
   0x1   :  { %13 = vsyncpa [#allocation6], 0 }
   0x2   :  { %14 = vsyncpa [#allocation9], 0 }
   0x3   :  { %15 = vsyncpa [#allocation4], 0  ;;  %s680_s24 = smov [#allocation5]   ;;  %s562_s28 = scalar_lea.hbm %s829_s1, 256 }
   0x4   :  { %s31_s25 = sshll.u32 %s680_s24, 4  ;;  %p563_p0 = scmp.ne.s32.totalorder %s829_s1, %s562_s28  ;;  %s32_s25 = int_to_ptr.vmem [resolvable:$true] %s31_s25 }
   0x5   :  { %p566_p1 = scmp.lt.u32.totalorder %s562_s28, %s829_s1 }
   0x7   :  { %p568_p2 = pnand %p566_p1, %p563_p0 }
   0x9   :  { %571 = shalt.err (!%p568_p2)
}
   0xa   :  { %s572_s10 = scalar_lea.vmem %s32_s25, 256  ;;  %p577_p4 = scmp.lt.s32.totalorder %s32_s25, %s32_s25 }
   0xb   :  { %p573_p3 = scmp.ne.s32.totalorder %s32_s25, %s572_s10  ;;  %p578_p5 = scmp.lt.s32.totalorder %s572_s10, %s572_s10 }
   0xd   :  { %p579_p6 = por %p578_p5, %p577_p4 }
   0xf   :  { %p580_p7 = pnand %p579_p6, %p573_p3 }
  0x11   :  { %583 = shalt.err (!%p580_p7)
}
  0x12   :  { %s681_s11 = smov 128   ;;  %s682_s12 = smov 8  }
  0x13   :  { %37 = dma.hbm_to_vmem [thread:$0]  %s829_s1, 256, %s32_s25, [#allocation6], %s681_s11, %s681_s11, %s682_s12  }
  0x14   :  { %s683_s15 = smov [#allocation2]   ;;  %s684_s17 = smov [#allocation7]  }
  0x15   :  { %s22_s16 = sshll.u32 %s683_s15, 4  ;;  %s45_s18 = sshll.u32 %s684_s17, 4  ;;  %s23_s16 = int_to_ptr.vmem [resolvable:$true] %s22_s16  ;;  %s46_s18 = int_to_ptr.vmem [resolvable:$true] %s45_s18 }
  0x16   :  { %s584_s21 = scalar_lea.hbm %s828_s0, 128 }
  0x17   :  { %p585_p8 = scmp.ne.s32.totalorder %s828_s0, %s584_s21  ;;  %p588_p9 = scmp.lt.u32.totalorder %s584_s21, %s828_s0 }
  0x19   :  { %p590_p10 = pnand %p588_p9, %p585_p8 }
  0x1b   :  { %593 = shalt.err (!%p590_p10)
}
  0x1c   :  { %s594_s1 = scalar_lea.vmem %s23_s16, 128  ;;  %p599_p12 = scmp.lt.s32.totalorder %s23_s16, %s23_s16 }
  0x1d   :  { %p595_p11 = scmp.ne.s32.totalorder %s23_s16, %s594_s1  ;;  %p600_p13 = scmp.lt.s32.totalorder %s594_s1, %s594_s1 }
  0x1f   :  { %p601_p0 = por %p600_p13, %p599_p12 }
  0x21   :  { %p602_p1 = pnand %p601_p0, %p595_p11 }
  0x23   :  { %605 = shalt.err (!%p602_p1)
}
  0x24   :  { %25 = dma.hbm_to_vmem [thread:$0]  %s828_s0, 128, %s23_s16, [#allocation3]  }
  0x25   :  { %s606_s30 = scalar_lea.hbm %s831_s3, 2048 }
  0x26   :  { %p607_p2 = scmp.ne.s32.totalorder %s831_s3, %s606_s30  ;;  %p610_p3 = scmp.lt.u32.totalorder %s606_s30, %s831_s3 }
  0x28   :  { %p612_p4 = pnand %p610_p3, %p607_p2 }
  0x2a   :  { %615 = shalt.err (!%p612_p4)
}
  0x2b   :  { %s616_s14 = scalar_lea.vmem %s46_s18, 2048  ;;  %p621_p6 = scmp.lt.s32.totalorder %s46_s18, %s46_s18 }
  0x2c   :  { %p617_p5 = scmp.ne.s32.totalorder %s46_s18, %s616_s14  ;;  %p622_p7 = scmp.lt.s32.totalorder %s616_s14, %s616_s14 }
  0x2e   :  { %p623_p8 = por %p622_p7, %p621_p6 }
  0x30   :  { %p624_p9 = pnand %p623_p8, %p617_p5 }
  0x32   :  { %627 = shalt.err (!%p624_p9)
}
  0x33   :  { %51 = dma.hbm_to_vmem [thread:$0]  %s831_s3, 2048, %s46_s18, [#allocation6], %s681_s11, %s681_s11, %s682_s12  }
  0x34   :  { %s685_s16 = smov [#allocation8]   ;;  %s628_s21 = scalar_lea.hbm %s833_s5, 2048 }
  0x35   :  { %s59_s17 = sshll.u32 %s685_s16, 4  ;;  %p629_p10 = scmp.ne.s32.totalorder %s833_s5, %s628_s21  ;;  %s60_s17 = int_to_ptr.vmem [resolvable:$true] %s59_s17 }
  0x36   :  { %p632_p11 = scmp.lt.u32.totalorder %s628_s21, %s833_s5 }
  0x38   :  { %p634_p12 = pnand %p632_p11, %p629_p10 }
  0x3a   :  { %637 = shalt.err (!%p634_p12)
}
  0x3b   :  { %s638_s1 = scalar_lea.vmem %s60_s17, 2048  ;;  %p643_p0 = scmp.lt.s32.totalorder %s60_s17, %s60_s17 }
  0x3c   :  { %p639_p13 = scmp.ne.s32.totalorder %s60_s17, %s638_s1  ;;  %p644_p1 = scmp.lt.s32.totalorder %s638_s1, %s638_s1 }
  0x3e   :  { %p645_p2 = por %p644_p1, %p643_p0 }
  0x40   :  { %p646_p3 = pnand %p645_p2, %p639_p13 }
  0x42   :  { %649 = shalt.err (!%p646_p3)
}
  0x43   :  { %65 = dma.hbm_to_vmem [thread:$0]  %s833_s5, 2048, %s60_s17, [#allocation9], %s681_s11, %s681_s11, %s682_s12  }
  0x44   :  { %672 = dma.done.wait [#allocation3], 128  }
  0x45   :  { %673 = vsyncadd [#allocation3], 4294967168 }
  0x46   :  { %674 = dma.done.wait [#allocation6], 2304  }
  0x47   :  { %675 = vsyncadd [#allocation6], 4294964992 }
  0x48   :  { %676 = dma.done.wait [#allocation9], 2048  }
  0x49   :  { %677 = vsyncadd [#allocation9], 4294965248  ;;  %v686_v0 = vmov 0.0|0.0   ;;  %vm687_vm0 = vmmov 0   ;;  %v688_v1 = vmov 0.0   ;;  %v81_v2 = vld [vmem:[#allocation5] sm:$0xff] }
  0x4a   :  { %497 = vmatprep.subr.bf16.mxu0 %v686_v0  ;;  %424 = vmatprep.mubr.msk.f32.mxu0 %vm687_vm0, %v688_v1  ;;  %v82_v3 = vld [vmem:[#allocation5 + $0x8] sm:$0xff]  ;;  %v165_v5 = vld [vmem:[#allocation7] sm:$0xff]  ;;  %v166_v6 = vld [vmem:[#allocation7 + $0x8] sm:$0xff]  ;;  %vm90_vm1 = vcmask 130048  }
  0x4b   :  { %500 = vmatprep.subr.bf16.mxu1 %v686_v0  ;;  %459 = vmatprep.mubr.msk.f32.mxu1 %vm687_vm0, %v688_v1  ;;  %v498_v4 = vpack.c.bf16 %v82_v3, %v81_v2  ;;  %v167_v7 = vld [vmem:[#allocation7 + $0x10] sm:$0xff]  ;;  %v501_v8 = vpack.c.bf16 %v166_v6, %v165_v5  ;;  %v168_v9 = vld [vmem:[#allocation7 + $0x18] sm:$0xff]  ;;  %v80_v10 = vld [vmem:[#allocation2] sm:$0xff] }
  0x4c   :  { %v504_v11 = vpack.c.bf16 %v168_v9, %v167_v7  ;;  %v169_v12 = vld [vmem:[#allocation7 + $0x20] sm:$0xff]  ;;  %v170_v13 = vld [vmem:[#allocation7 + $0x28] sm:$0xff]  ;;  %v171_v15 = vld [vmem:[#allocation7 + $0x30] sm:$0xff] }
  0x4d   :  { %499 = vmatpush3.bf16.msra.mxu0 %v498_v4  ;;  %502 = vmatpush3.bf16.msra.mxu1 %v501_v8  ;;  %v507_v14 = vpack.c.bf16 %v170_v13, %v169_v12  ;;  %v172_v16 = vld [vmem:[#allocation7 + $0x38] sm:$0xff]  ;;  %v173_v18 = vld [vmem:[#allocation7 + $0x40] sm:$0xff]  ;;  %v174_v19 = vld [vmem:[#allocation7 + $0x48] sm:$0xff] }
  0x4e   :  { %524 = vmatprep.subr.bf16.mxu0 %v686_v0  ;;  %503 = vmatprep.subr.bf16.mxu1 %v686_v0  ;;  %v510_v17 = vpack.c.bf16 %v172_v16, %v171_v15  ;;  %v513_v20 = vpack.c.bf16 %v174_v19, %v173_v18  ;;  %v175_v21 = vld [vmem:[#allocation7 + $0x50] sm:$0xff]  ;;  %v176_v22 = vld [vmem:[#allocation7 + $0x58] sm:$0xff]  ;;  %v177_v24 = vld [vmem:[#allocation7 + $0x60] sm:$0xff] }
  0x4f   :  { %v516_v23 = vpack.c.bf16 %v176_v22, %v175_v21  ;;  %v178_v25 = vld [vmem:[#allocation7 + $0x68] sm:$0xff]  ;;  %v179_v27 = vld [vmem:[#allocation7 + $0x70] sm:$0xff]  ;;  %v180_v28 = vld [vmem:[#allocation7 + $0x78] sm:$0xff] }
  0x50   :  { %425 = vmatmul.mubr.msk.f32.vlgmr.msra.gmra.mrb[0].mxu0 %vm90_vm1, %v80_v10  ;;  %v519_v26 = vpack.c.bf16 %v178_v25, %v177_v24  ;;  %v522_v29 = vpack.c.bf16 %v180_v28, %v179_v27  ;;  %v259_v30 = vld [vmem:[#allocation8] sm:$0xff]  ;;  %v260_v31 = vld [vmem:[#allocation8 + $0x8] sm:$0xff]  ;;  %v261_v32 = vld [vmem:[#allocation8 + $0x10] sm:$0xff] }
  0x51   :  { %494 = vmatprep.mubr.msk.f32.mxu0 %vm687_vm0, %v688_v1  ;;  %505 = vmatpush3.bf16.msra.mxu1 %v504_v11  ;;  %v525_v33 = vpack.c.bf16 %v260_v31, %v259_v30  ;;  %v262_v34 = vld [vmem:[#allocation8 + $0x18] sm:$0xff]  ;;  %v263_v36 = vld [vmem:[#allocation8 + $0x20] sm:$0xff]  ;;  %v264_v37 = vld [vmem:[#allocation8 + $0x28] sm:$0xff] }
  0x52   :  { %506 = vmatprep.subr.bf16.mxu1 %v686_v0  ;;  %v528_v35 = vpack.c.bf16 %v262_v34, %v261_v32  ;;  %v531_v38 = vpack.c.bf16 %v264_v37, %v263_v36  ;;  %v265_v39 = vld [vmem:[#allocation8 + $0x30] sm:$0xff]  ;;  %v266_v40 = vld [vmem:[#allocation8 + $0x38] sm:$0xff]  ;;  %v267_v42 = vld [vmem:[#allocation8 + $0x40] sm:$0xff] }
  0x53   :  { %526 = vmatpush3.bf16.msra.mxu0 %v525_v33  ;;  %v534_v41 = vpack.c.bf16 %v266_v40, %v265_v39  ;;  %v268_v43 = vld [vmem:[#allocation8 + $0x48] sm:$0xff]  ;;  %v269_v45 = vld [vmem:[#allocation8 + $0x50] sm:$0xff]  ;;  %v270_v46 = vld [vmem:[#allocation8 + $0x58] sm:$0xff] }
  0x54   :  { %527 = vmatprep.subr.bf16.mxu0 %v686_v0  ;;  %v537_v44 = vpack.c.bf16 %v268_v43, %v267_v42  ;;  %v540_v47 = vpack.c.bf16 %v270_v46, %v269_v45  ;;  %v271_v48 = vld [vmem:[#allocation8 + $0x60] sm:$0xff]  ;;  %v272_v49 = vld [vmem:[#allocation8 + $0x68] sm:$0xff]  ;;  %v273_v56 = vld [vmem:[#allocation8 + $0x70] sm:$0xff] }
  0x55   :  { %508 = vmatpush3.bf16.msra.mxu1 %v507_v14  ;;  %v543_v50 = vpack.c.bf16 %v272_v49, %v271_v48  ;;  %v379_v51 = vld [vmem:[%s830_s2] ss:$0 sm:$0xff]  ;;  %v274_v57 = vld [vmem:[#allocation8 + $0x78] sm:$0xff] }
  0x56   :  { %509 = vmatprep.subr.bf16.mxu1 %v686_v0  ;;  %v546_v58 = vpack.c.bf16 %v274_v57, %v273_v56  ;;  %v381_v59 = vld [vmem:[%s832_s4] ss:$0 sm:$0xff]  ;;  %s689_s4 = smov [#allocation10]  }
  0x57   :  { %529 = vmatpush3.bf16.msra.mxu0 %v528_v35  ;;  %s368_s28 = sshll.u32 %s689_s4, 4  ;;  %s369_s28 = int_to_ptr.vmem [resolvable:$true] %s368_s28 }
  0x58   :  { %530 = vmatprep.subr.bf16.mxu0 %v686_v0  ;;  %s650_s29 = scalar_lea.vmem %s369_s28, 128  ;;  %p655_p5 = scmp.lt.s32.totalorder %s369_s28, %s369_s28 }
  0x59   :  { %511 = vmatpush3.bf16.msra.mxu1 %v510_v17  ;;  %p651_p4 = scmp.ne.s32.totalorder %s369_s28, %s650_s29  ;;  %p656_p6 = scmp.lt.s32.totalorder %s650_s29, %s650_s29 }
  0x5a   :  { %512 = vmatprep.subr.bf16.mxu1 %v686_v0 }
  0x5b   :  { %532 = vmatpush3.bf16.msra.mxu0 %v531_v38  ;;  %p657_p7 = por %p656_p6, %p655_p5 }
  0x5c   :  { %533 = vmatprep.subr.bf16.mxu0 %v686_v0 }
  0x5d   :  { %514 = vmatpush3.bf16.msra.mxu1 %v513_v20  ;;  %p658_p8 = pnand %p657_p7, %p651_p4 }
  0x5e   :  { %515 = vmatprep.subr.bf16.mxu1 %v686_v0 }
  0x5f   :  { %535 = vmatpush3.bf16.msra.mxu0 %v534_v41 }
  0x60   :  { %536 = vmatprep.subr.bf16.mxu0 %v686_v0 }
  0x61   :  { %517 = vmatpush3.bf16.msra.mxu1 %v516_v23 }
  0x62   :  { %518 = vmatprep.subr.bf16.mxu1 %v686_v0 }
  0x63   :  { %538 = vmatpush3.bf16.msra.mxu0 %v537_v44 }
  0x64   :  { %539 = vmatprep.subr.bf16.mxu0 %v686_v0 }
  0x65   :  { %520 = vmatpush3.bf16.msra.mxu1 %v519_v26 }
  0x66   :  { %521 = vmatprep.subr.bf16.mxu1 %v686_v0 }
  0x67   :  { %541 = vmatpush3.bf16.msra.mxu0 %v540_v47 }
  0x68   :  { %542 = vmatprep.subr.bf16.mxu0 %v686_v0 }
  0x69   :  { %523 = vmatpush3.bf16.msra.mxu1 %v522_v29 }
  0x6b   :  { %544 = vmatpush3.bf16.msra.mxu0 %v543_v50 }
  0x6c   :  { %545 = vmatprep.subr.bf16.mxu0 %v686_v0  ;;  %v382_v0 = vld [vmem:[%s834_s6] ss:$0 sm:$0xff] }
  0x6f   :  { %547 = vmatpush3.bf16.msra.mxu0 %v546_v58 }
 0x123   :  { %v160_v52 = vpop.f32.mrb[0].mxu0 }
 0x124   :  { %v161_v53 = vadd.f32 %v379_v51, %v160_v52  ;;  %v426_v54 = vpop.f32.mrb[1].mxu0 }
 0x126   :  { %v164_v55 = vmax.f32 %v161_v53, 0.0 }
 0x128   :  { %460 = vmatmul.mubr.f32.vlgmr.msra.gmra.mrb[0].mxu1 %v164_v55 }
 0x1fb   :  { %v254_v60 = vpop.f32.mrb[0].mxu1 }
 0x1fc   :  { %v255_v61 = vadd.f32 %v381_v59, %v254_v60  ;;  %v461_v62 = vpop.f32.mrb[1].mxu1 }
 0x1fe   :  { %v258_v63 = vmax.f32 %v255_v61, 0.0 }
 0x200   :  { %495 = vmatmul.mubr.f32.vlgmr.msra.gmra.mrb[2].mxu0 %v258_v63 }
 0x2d3   :  { %v348_v1 = vpop.f32.mrb[2].mxu0 }
 0x2d4   :  { %v349_v2 = vadd.f32 %v382_v0, %v348_v1  ;;  %v496_v3 = vpop.f32.mrb[3].mxu0 }
 0x2d6   :  { %352 = vmax.xlane.f32.xlu0 %v349_v2 }
 0x363   :  { %v353_v4 = vpop.xlane.xlu0 %352 }
 0x364   :  { %v354_v5 = vsub.f32 %v349_v2, %v353_v4 }
 0x366   :  { %v355_v6 = vmul.f32 1.442695, %v354_v5 }
 0x368   :  { %558 = vpow2.f32 %v355_v6 }
 0x372   :  { %v559_v7 = vpop.eup %558 }
 0x373   :  { %357 = vadd.xlane.f32.xlu0 %v559_v7 }
 0x400   :  { %v358_v8 = vpop.xlane.xlu0 %357 }
 0x401   :  { %560 = vrcp.f32 %v358_v8 }
 0x40b   :  { %v561_v9 = vpop.eup %560 }
 0x40c   :  { %v360_v10 = vmul.f32 %v561_v9, %v559_v7 }
 0x40e   :  { %361 = vst [vmem:[#allocation10] sm:$0xff] %v360_v10 }
 0x40f   :  { %661 = shalt.err (!%p658_p8)
}
 0x410   :  { %s662_s8 = scalar_lea.hbm %s835_s7, 128 }
 0x411   :  { %p663_p9 = scmp.ne.s32.totalorder %s835_s7, %s662_s8  ;;  %p666_p10 = scmp.lt.u32.totalorder %s662_s8, %s835_s7 }
 0x413   :  { %p668_p11 = pnand %p666_p10, %p663_p9 }
 0x415   :  { %671 = shalt.err (!%p668_p11)
}
 0x416   :  { %371 = dma.vmem_to_hbm [thread:$0]  %s369_s28, 128, %s835_s7, [#allocation4]  }
 0x417   :  { %678 = dma.done.wait [#allocation4], 128  }
 0x418   :  { %679 = vsyncadd [#allocation4], 4294967168 }
 0x419   :  { %375 = vsyncpa [#allocation3], 1 }
 0x41a   :  { %376 = vsyncpa [#allocation6], 1 }
 0x41b   :  { %377 = vsyncpa [#allocation9], 1 }
 0x41c   :  { %378 = vsyncpa [#allocation4], 1 }

</bundles_post_ra>
